<compile_context>
chip_gen: v7x
topology: tpu7x:2x2x1
jax: 0.10.0
libtpu: 0.0.40
codegen_flags: <defaults>
</compile_context>

<pallas_src>
import jax
import jax.numpy as jnp
from jax.experimental import pallas as pl
from jax.experimental.pallas import tpu as pltpu

IGNORE_INDEX = -100  # CrossEntropyLoss default ignore_index


# ----------------------------------------------------------------------------
# Kernel: per-tile cross-entropy partial sum.
#   labels_ref : (T, 1)   int32   shifted labels (IGNORE_INDEX == ignored row)
#   logits_ref : (T, V)   float   logit rows (native dtype, no upcast copy)
#   psum_ref   : (1, 128) float32 sum of per-row losses for this tile
# ----------------------------------------------------------------------------
def _ce_partial_kernel(labels_ref, logits_ref, psum_ref):
    x = logits_ref[...]                                         # (T, V) native dtype
    lbl = labels_ref[...]                                       # (T, 1) int32
    valid = lbl != IGNORE_INDEX                                 # (T, 1) bool

    # numerically stable log-sum-exp per row; exp in native dtype (bf16 EUP on
    # v6e/v7x), accumulate the row sum in f32.
    m = jnp.max(x, axis=-1, keepdims=True)                      # (T, 1)
    e = jnp.exp(x - m)                                          # (T, V)
    s = jnp.sum(e, axis=-1, keepdims=True, dtype=jnp.float32)   # (T, 1) f32
    lse = m.astype(jnp.float32) + jnp.log(s)                    # (T, 1) f32

    # target logit via select + sum (no one-hot multiply / extra f32 temp);
    # ignored or out-of-range labels simply select nothing -> 0, then masked.
    col = jax.lax.broadcasted_iota(jnp.int32, x.shape, 1)       # (T, V)
    tgt = jnp.sum(jnp.where(col == lbl, x, 0.0),
                  axis=-1, keepdims=True, dtype=jnp.float32)    # (T, 1) f32

    per_row = jnp.where(valid, lse - tgt, 0.0)                  # (T, 1) f32
    psum = jnp.sum(per_row, axis=0, keepdims=True)              # (1, 1)
    psum_ref[...] = jnp.broadcast_to(psum, psum_ref.shape)


# ----------------------------------------------------------------------------
# Per-generation sizing.
# ----------------------------------------------------------------------------
def _vmem_limit_bytes():
    """Scoped VMEM budget derived from the chip: ~48 MiB v7x, 64 MiB v5e/v6e."""
    try:
        cap = pltpu.get_tpu_info().vmem_capacity_bytes
    except Exception:
        cap = 128 * 1024 * 1024
    return int(min(cap * 3 // 4, 64 * 1024 * 1024))


def _choose_rows_per_tile(n_rows, vocab, itemsize, vmem_limit):
    """Rows per grid step.

    The logits block is double-buffered and the kernel keeps ~2 block-sized
    temporaries (exp result, masked gather), so budget ~1/5 of the scoped
    VMEM limit for one block.  Rows are rounded to the dtype's sublane
    packing (8 for f32, 16 for bf16, 32 for int8/fp8).
    """
    target_bytes = min(vmem_limit // 5, 16 * 1024 * 1024)
    pack = max(8, 32 // max(1, itemsize))
    t = max(1, target_bytes // max(1, vocab * itemsize))
    t = max(pack, (t // pack) * pack)
    n_ceil = ((n_rows + pack - 1) // pack) * pack
    return int(min(t, n_ceil, 4096))


# ----------------------------------------------------------------------------
# Full forward of LossPipeLayer.
# ----------------------------------------------------------------------------
def loss_pipe_layer_forward(logits, labels, *, rows_per_tile=None):
    B, S, V = logits.shape
    assert labels.shape == (B, S)

    # Fold the sequence shift into the labels (row (b,s) <-> labels[b,s+1]);
    # last row of each batch is ignored.  Avoids materializing logits[:,:-1,:].
    shifted = jnp.concatenate(
        [labels[:, 1:], jnp.full((B, 1), IGNORE_INDEX, labels.dtype)], axis=1
    ).astype(jnp.int32)

    n_rows = B * S
    logits_flat = logits.reshape(n_rows, V)      # layout-free reshape
    labels_flat = shifted.reshape(n_rows)

    vmem_limit = _vmem_limit_bytes()
    T = rows_per_tile or _choose_rows_per_tile(
        n_rows, V, logits.dtype.itemsize, vmem_limit
    )
    n_tiles = pl.cdiv(n_rows, T)
    n_pad = n_tiles * T
    if n_pad != n_rows:
        # Pad labels (tiny) with IGNORE_INDEX; any out-of-range logits rows in
        # the last block are masked via select, so their contents never matter.
        labels_flat = jnp.pad(
            labels_flat, (0, n_pad - n_rows), constant_values=IGNORE_INDEX
        )
    labels_2d = labels_flat.reshape(n_pad, 1)

    cost = pl.CostEstimate(
        flops=5 * n_rows * V,
        transcendentals=n_rows * V,
        bytes_accessed=(n_rows * V * logits.dtype.itemsize
                        + n_pad * 4 + n_tiles * 128 * 4),
    )

    psum = pl.pallas_call(
        _ce_partial_kernel,
        out_shape=jax.ShapeDtypeStruct((n_tiles, 128), jnp.float32),
        grid_spec=pltpu.PrefetchScalarGridSpec(
            num_scalar_prefetch=0,
            grid=(n_tiles,),
            in_specs=[
                pl.BlockSpec((T, 1), lambda i: (i, 0)),   # shifted labels
                pl.BlockSpec((T, V), lambda i: (i, 0)),   # logits rows
            ],
            out_specs=pl.BlockSpec((1, 128), lambda i: (i, 0)),
        ),
        compiler_params=pltpu.CompilerParams(
            dimension_semantics=("parallel",),    # both TCs on v7x
            vmem_limit_bytes=vmem_limit,
        ),
        cost_estimate=cost,
    )(labels_2d, logits_flat)

    total = jnp.sum(psum[:, 0])
    # Denominator from the tiny label array, outside the kernel.
    count = jnp.sum(shifted != IGNORE_INDEX).astype(jnp.float32)
    return total / count              # mean reduction (0/0 -> nan, as torch)


# ----------------------------------------------------------------------------
# Plain-JAX reference (== torch CrossEntropyLoss on shifted logits/labels).
# ----------------------------------------------------------------------------
def _reference_loss(logits, labels):
    B, S, V = logits.shape
    sl = logits[:, :-1, :].reshape(-1, V).astype(jnp.float32)
    st = labels[:, 1:].reshape(-1)
    valid = st != IGNORE_INDEX
    lse = jax.scipy.special.logsumexp(sl, axis=-1)
    tgt = jnp.take_along_axis(sl, jnp.clip(st, 0, V - 1)[:, None], axis=-1)[:, 0]
    return jnp.sum(jnp.where(valid, lse - tgt, 0.0)) / jnp.sum(valid)


if __name__ == "__main__":
    B, S, V = 2, 8, 32

    key = jax.random.PRNGKey(0)
    k_logits, k_labels = jax.random.split(key)

    logits = jax.random.normal(k_logits, (B, S, V), dtype=jnp.float32)
    labels = jax.random.randint(k_labels, (B, S), 0, V, dtype=jnp.int32)
    labels = labels.at[0, 1].set(IGNORE_INDEX)   # exercise ignore_index path

    loss = jax.block_until_ready(loss_pipe_layer_forward(logits, labels))
    ref = _reference_loss(logits, labels)

    assert loss.shape == ()
    assert jnp.isfinite(loss)
    assert jnp.allclose(loss, ref, rtol=1e-5, atol=1e-5), (float(loss), float(ref))

    # Also exercise the bf16 (no-upcast) path with a lane-full vocab.
    logits_bf = jax.random.normal(k_logits, (B, S, 128), dtype=jnp.bfloat16)
    labels_bf = jax.random.randint(k_labels, (B, S), 0, 128, dtype=jnp.int32)
    loss_bf = jax.block_until_ready(loss_pipe_layer_forward(logits_bf, labels_bf))
    ref_bf = _reference_loss(logits_bf, labels_bf)
    assert jnp.isfinite(loss_bf)
    assert jnp.allclose(loss_bf, ref_bf, rtol=5e-2, atol=5e-2), (
        float(loss_bf), float(ref_bf))

    print("KERNEL_OK")
</pallas_src>

<mosaic_0001>
module attributes {stable_mosaic.version = 11 : i64} {
  func.func @_ce_partial_kernel(%arg0: i32, %arg1: memref<16x1xi32, #tpu.memory_space<vmem>>, %arg2: memref<16x32xf32, #tpu.memory_space<vmem>>, %arg3: memref<1x128xf32, #tpu.memory_space<vmem>>) attributes {dimension_semantics = [#tpu.dimension_semantics<parallel>], iteration_bounds = array<i64: 1>, scalar_prefetch = 0 : i64, scratch_operands = 0 : i64, tpu.core_type = #tpu.core_type<tc>, window_params = [{transform_indices = @transform_0, window_bounds = array<i64: 16, 1>}, {transform_indices = @transform_1, window_bounds = array<i64: 16, 32>}, {transform_indices = @transform_2, window_bounds = array<i64: 1, 128>}]} {
    %c0 = arith.constant 0 : index
    %c0_0 = arith.constant 0 : index
    %0 = vector.load %arg2[%c0, %c0_0] : memref<16x32xf32, #tpu.memory_space<vmem>>, vector<16x32xf32>
    %c0_1 = arith.constant 0 : index
    %c0_2 = arith.constant 0 : index
    %1 = vector.load %arg1[%c0_1, %c0_2] : memref<16x1xi32, #tpu.memory_space<vmem>>, vector<16x1xi32>
    %c-100_i32 = arith.constant -100 : i32
    %2 = vector.broadcast %c-100_i32 : i32 to vector<16x1xi32>
    %3 = arith.cmpi ne, %1, %2 : vector<16x1xi32>
    %cst = arith.constant dense<0xFF800000> : vector<16xf32>
    %4 = vector.multi_reduction <maximumf>, %0, %cst [1] : vector<16x32xf32> to vector<16xf32>
    %5 = vector.shape_cast %4 : vector<16xf32> to vector<16x1xf32>
    %6 = vector.broadcast %5 : vector<16x1xf32> to vector<16x32xf32>
    %7 = arith.subf %0, %6 : vector<16x32xf32>
    %8 = math.exp %7 : vector<16x32xf32>
    %cst_3 = arith.constant dense<0.000000e+00> : vector<16xf32>
    %9 = vector.multi_reduction <add>, %8, %cst_3 [1] : vector<16x32xf32> to vector<16xf32>
    %10 = vector.shape_cast %9 : vector<16xf32> to vector<16x1xf32>
    %11 = math.log %10 : vector<16x1xf32>
    %12 = arith.addf %5, %11 : vector<16x1xf32>
    %13 = tpu.iota {dimensions = array<i32: 1>} : vector<16x32xi32>
    %14 = vector.broadcast %1 : vector<16x1xi32> to vector<16x32xi32>
    %15 = arith.cmpi eq, %13, %14 : vector<16x32xi32>
    %cst_4 = arith.constant 0.000000e+00 : f32
    %16 = vector.broadcast %cst_4 : f32 to vector<16x32xf32>
    %17 = arith.select %15, %0, %16 : vector<16x32xi1>, vector<16x32xf32>
    %cst_5 = arith.constant dense<0.000000e+00> : vector<16xf32>
    %18 = vector.multi_reduction <add>, %17, %cst_5 [1] : vector<16x32xf32> to vector<16xf32>
    %19 = vector.shape_cast %18 : vector<16xf32> to vector<16x1xf32>
    %20 = arith.subf %12, %19 : vector<16x1xf32>
    %cst_6 = arith.constant 0.000000e+00 : f32
    %21 = vector.broadcast %cst_6 : f32 to vector<16x1xf32>
    %22 = arith.select %3, %20, %21 : vector<16x1xi1>, vector<16x1xf32>
    %cst_7 = arith.constant dense<0.000000e+00> : vector<1xf32>
    %23 = vector.multi_reduction <add>, %22, %cst_7 [0] : vector<16x1xf32> to vector<1xf32>
    %24 = vector.shape_cast %23 : vector<1xf32> to vector<1x1xf32>
    %25 = vector.shape_cast %24 : vector<1x1xf32> to vector<1x1xf32>
    %26 = vector.broadcast %25 : vector<1x1xf32> to vector<1x128xf32>
    %c0_8 = arith.constant 0 : index
    %c0_9 = arith.constant 0 : index
    %27 = vector.load %arg3[%c0_8, %c0_9] : memref<1x128xf32, #tpu.memory_space<vmem>>, vector<1x128xf32>
    tpu.vector_store %arg3[%c0_8, %c0_9], %26 {strides = array<i32>} : memref<1x128xf32, #tpu.memory_space<vmem>>, vector<1x128xf32>,
    return
  }
  func.func @transform_0(%arg0: i32) -> (i32, i32) {
    %c0_i32 = arith.constant 0 : i32
    %c0_i32_0 = arith.constant 0 : i32
    return %arg0, %c0_i32 : i32, i32
  }
  func.func @transform_1(%arg0: i32) -> (i32, i32) {
    %c0_i32 = arith.constant 0 : i32
    %c0_i32_0 = arith.constant 0 : i32
    return %arg0, %c0_i32 : i32, i32
  }
  func.func @transform_2(%arg0: i32) -> (i32, i32) {
    %c0_i32 = arith.constant 0 : i32
    %c0_i32_0 = arith.constant 0 : i32
    return %arg0, %c0_i32 : i32, i32
  }
}

</mosaic_0001>

<bundles_post_ra>
// kernel: tpu_custom_call.1
= control target key start
LH: loop header
LB: loop body
LE: loop exit
PB: predicated region body
PF: predicated region fallthrough
CT: control target
= control target key end

     0   :  { %7 = vsyncpa [#allocation3], 0  ;;  %s276_s0 = inlined_call_operand.hbm [shape: s32[16,1], index: 0, kind: input, shape index: {}]   ;;  %s277_s1 = inlined_call_operand.hbm [shape: f32[16,32], index: 1, kind: input, shape index: {}]   ;;  %s278_s2 = inlined_call_operand.hbm [shape: f32[1,128], index: 2, kind: output, shape index: {}]  }
   0x1   :  { %8 = vsyncpa [#allocation6], 0 }
   0x2   :  { %9 = vsyncpa [#allocation4], 0  ;;  %s213_s9 = smov [#allocation2]   ;;  %s141_s13 = scalar_lea.hbm %s276_s0, 256 }
   0x3   :  { %s15_s10 = sshll.u32 %s213_s9, 4  ;;  %p142_p0 = scmp.ne.s32.totalorder %s276_s0, %s141_s13  ;;  %s16_s10 = int_to_ptr.vmem [resolvable:$true] %s15_s10 }
   0x4   :  { %p145_p1 = scmp.lt.u32.totalorder %s141_s13, %s276_s0 }
   0x6   :  { %p147_p2 = pnand %p145_p1, %p142_p0 }
   0x8   :  { %150 = shalt.err (!%p147_p2)
}
   0x9   :  { %s151_s18 = scalar_lea.vmem %s16_s10, 256  ;;  %p156_p4 = scmp.lt.s32.totalorder %s16_s10, %s16_s10 }
   0xa   :  { %p152_p3 = scmp.ne.s32.totalorder %s16_s10, %s151_s18  ;;  %p157_p5 = scmp.lt.s32.totalorder %s151_s18, %s151_s18 }
   0xc   :  { %p158_p6 = por %p157_p5, %p156_p4 }
   0xe   :  { %p159_p7 = pnand %p158_p6, %p152_p3 }
  0x10   :  { %162 = shalt.err (!%p159_p7)
}
  0x11   :  { %s214_s19 = smov 128   ;;  %s215_s20 = smov 8  }
  0x12   :  { %21 = dma.hbm_to_vmem [thread:$0]  %s276_s0, 256, %s16_s10, [#allocation3], %s214_s19, %s214_s19, %s215_s20  }
  0x13   :  { %s216_s23 = smov [#allocation5]   ;;  %s163_s27 = scalar_lea.hbm %s277_s1, 256 }
  0x14   :  { %s27_s24 = sshll.u32 %s216_s23, 4  ;;  %p164_p8 = scmp.ne.s32.totalorder %s277_s1, %s163_s27  ;;  %s28_s24 = int_to_ptr.vmem [resolvable:$true] %s27_s24 }
  0x15   :  { %p167_p9 = scmp.lt.u32.totalorder %s163_s27, %s277_s1 }
  0x17   :  { %p169_p10 = pnand %p167_p9, %p164_p8 }
  0x19   :  { %172 = shalt.err (!%p169_p10)
}
  0x1a   :  { %s173_s4 = scalar_lea.vmem %s28_s24, 256  ;;  %p178_p12 = scmp.lt.s32.totalorder %s28_s24, %s28_s24 }
  0x1b   :  { %p174_p11 = scmp.ne.s32.totalorder %s28_s24, %s173_s4  ;;  %p179_p13 = scmp.lt.s32.totalorder %s173_s4, %s173_s4 }
  0x1d   :  { %p180_p0 = por %p179_p13, %p178_p12 }
  0x1f   :  { %p181_p1 = pnand %p180_p0, %p174_p11 }
  0x21   :  { %184 = shalt.err (!%p181_p1)
}
  0x22   :  { %33 = dma.hbm_to_vmem [thread:$0]  %s277_s1, 256, %s28_s24, [#allocation6], %s214_s19, %s214_s19, %s215_s20  }
  0x23   :  { %207 = dma.done.wait [#allocation3], 256  }
  0x24   :  { %208 = vsyncadd [#allocation3], 4294967040 }
  0x25   :  { %209 = dma.done.wait [#allocation6], 256  }
  0x26   :  { %210 = vsyncadd [#allocation6], 4294967040  ;;  %v217_v0 = vmov 0   ;;  %vm46_vm0 = vcmask 261120   ;;  %v40_v1 = vld [vmem:[#allocation5] sm:$0xff]  ;;  %v41_v2 = vld [vmem:[#allocation5 + $0x8] sm:$0xff]  ;;  %v71_v11 = vlaneseq }
  0x27   :  { %131 = vset.pattern.permute.xlu1 %v217_v0  ;;  %132 = vset.pattern.permute.xlu0 %v217_v0  ;;  %v42_v3 = vld [vmem:[#allocation2] sm:$0xff]  ;;  %v47_v4 = vsel %vm46_vm0, %v40_v1, -inf  ;;  %v43_v5 = vld [vmem:[#allocation2 + $0x8] sm:$0xff]  ;;  %v50_v6 = vsel %vm46_vm0, %v41_v2, -inf  ;;  %vm93_vm5 = vcmask 7168   ;;  %s218_s1 = smov [#allocation7]  }
  0x28   :  { %74 = vperm.xlu1 %131, %v42_v3   ;;  %48 = vmax.xlane.f32.xlu0 %v47_v4  ;;  %v72_v15 = vand.u32 127, %v71_v11  ;;  %vm44_vm3 = vcmp.ne.s32.totalorder %v42_v3, 4294967196  ;;  %vm45_vm4 = vcmp.ne.s32.totalorder %v43_v5, 4294967196  ;;  %s115_s6 = sshll.u32 %s218_s1, 4  ;;  %s116_s6 = int_to_ptr.vmem [resolvable:$true] %s115_s6 }
  0x29   :  { %s185_s7 = scalar_lea.vmem %s116_s6, 16  ;;  %s189_s8 = scalar_lea.vmem %s116_s6, 32 }
  0x2a   :  { %p186_p2 = scmp.ne.s32.totalorder %s116_s6, %s185_s7  ;;  %p190_p3 = scmp.lt.s32.totalorder %s116_s6, %s116_s6 }
  0x2b   :  { %p191_p4 = scmp.lt.s32.totalorder %s189_s8, %s185_s7 }
  0x2c   :  { %77 = vperm.xlu1 %131, %v43_v5   ;;  %51 = vmax.xlane.f32.xlu0 %v50_v6 }
  0x2d   :  { %p192_p5 = por %p191_p4, %p190_p3 }
  0x2f   :  { %p193_p6 = pnand %p192_p5, %p186_p2 }
  0xa7   :  { %v75_v14 = vpop.permute.xlu1 %74 }
  0xa8   :  { %vm79_vm1 = vcmp.eq.s32.totalorder %v72_v15, %v75_v14 }
  0xa9   :  { %v81_v18 = vsel %vm79_vm1, %v40_v1, 0.0 }
  0xaa   :  { %v83_v20 = vsel %vm46_vm0, %v81_v18, 0.0 }
  0xab   :  { %v78_v16 = vpop.permute.xlu1 %77 }
  0xac   :  { %vm80_vm2 = vcmp.eq.s32.totalorder %v72_v15, %v78_v16 }
  0xad   :  { %v82_v22 = vsel %vm80_vm2, %v41_v2, 0.0 }
  0xae   :  { %v86_v24 = vsel %vm46_vm0, %v82_v22, 0.0 }
  0xb5   :  { %v49_v7 = vpop.xlane.xlu0 %48 }
  0xb6   :  { %v53_v8 = vsub.f32 %v40_v1, %v49_v7 }
  0xb8   :  { %v55_v9 = vmul.f32 1.442695, %v53_v8 }
  0xb9   :  { %v52_v10 = vpop.xlane.xlu0 %51 }
  0xba   :  { %133 = vpow2.f32 %v55_v9  ;;  %v54_v12 = vsub.f32 %v41_v2, %v52_v10 }
  0xbc   :  { %v57_v13 = vmul.f32 1.442695, %v54_v12 }
  0xbe   :  { %135 = vpow2.f32 %v57_v13 }
  0xc4   :  { %v134_v17 = vpop.eup %133 }
  0xc5   :  { %v59_v19 = vsel %vm46_vm0, %v134_v17, 0.0 }
  0xc6   :  { %60 = vadd.xlane.f32.xlu0 %v59_v19 }
  0xc8   :  { %v136_v21 = vpop.eup %135 }
  0xc9   :  { %v62_v23 = vsel %vm46_vm0, %v136_v21, 0.0 }
  0xca   :  { %63 = vadd.xlane.f32.xlu1 %v62_v23  ;;  %84 = vadd.xlane.f32.xlu0 %v83_v20 }
  0xce   :  { %87 = vadd.xlane.f32.xlu0 %v86_v24 }
 0x153   :  { %v61_v25 = vpop.xlane.xlu0 %60 }
 0x154   :  { %137 = vlog2.f32 %v61_v25 }
 0x157   :  { %v64_v26 = vpop.xlane.xlu1 %63  ;;  %v85_v29 = vpop.xlane.xlu0 %84 }
 0x158   :  { %139 = vlog2.f32 %v64_v26 }
 0x15b   :  { %v88_v35 = vpop.xlane.xlu0 %87 }
 0x15e   :  { %v138_v27 = vpop.eup %137 }
 0x15f   :  { %v66_v28 = vmul.f32 0.6931472, %v138_v27 }
 0x161   :  { %v69_v30 = vadd.f32 %v66_v28, %v49_v7 }
 0x162   :  { %v140_v31 = vpop.eup %139 }
 0x163   :  { %v68_v32 = vmul.f32 0.6931472, %v140_v31  ;;  %v89_v33 = vsub.f32 %v69_v30, %v85_v29 }
 0x165   :  { %v70_v34 = vadd.f32 %v68_v32, %v52_v10  ;;  %v91_v36 = vsel %vm44_vm3, %v89_v33, 0.0 }
 0x166   :  { %v94_v39 = vsel %vm93_vm5, %v91_v36, 0.0 }
 0x167   :  { %v90_v37 = vsub.f32 %v70_v34, %v88_v35 }
 0x169   :  { %v92_v38 = vsel %vm45_vm4, %v90_v37, 0.0 }
 0x16a   :  { %v95_v40 = vsel %vm93_vm5, %v92_v38, 0.0 }
 0x16b   :  { %v96_v41 = vadd.f32 %v95_v40, %v94_v39 }
 0x16d   :  { %v97_v42 = vrot.slane %v96_v41, 4 }
 0x16f   :  { %v98_v43 = vadd.f32 %v97_v42, %v96_v41 }
 0x171   :  { %v99_v44 = vrot.slane %v98_v43, 2 }
 0x173   :  { %v100_v45 = vadd.f32 %v99_v44, %v98_v43 }
 0x175   :  { %v101_v46 = vrot.slane %v100_v45, 1 }
 0x177   :  { %v102_v47 = vadd.f32 %v101_v46, %v100_v45 }
 0x179   :  { %105 = vperm.xlu0 %132, %v102_v47  }
 0x1f8   :  { %v106_v48 = vpop.permute.xlu0 %105 }
 0x1f9   :  { %108 = vst [vmem:[#allocation7] sm:$0x1] %v106_v48 }
 0x1fa   :  { %196 = shalt.err (!%p193_p6)
}
 0x1fb   :  { %s197_s11 = scalar_lea.hbm %s278_s2, 16 }
 0x1fc   :  { %p198_p7 = scmp.ne.s32.totalorder %s278_s2, %s197_s11  ;;  %p201_p8 = scmp.lt.u32.totalorder %s197_s11, %s278_s2 }
 0x1fe   :  { %p203_p9 = pnand %p201_p8, %p198_p7 }
 0x200   :  { %206 = shalt.err (!%p203_p9)
}
 0x201   :  { %118 = dma.vmem_to_hbm [thread:$0]  %s116_s6, 16, %s278_s2, [#allocation4]  }
 0x202   :  { %211 = dma.done.wait [#allocation4], 16  }
 0x203   :  { %212 = vsyncadd [#allocation4], 4294967280 }
 0x204   :  { %122 = vsyncpa [#allocation3], 1 }
 0x205   :  { %123 = vsyncpa [#allocation6], 1 }
 0x206   :  { %124 = vsyncpa [#allocation4], 1 }

</bundles_post_ra>
